<compile_context>
chip_gen: v7x
topology: tpu7x:2x2x1
jax: 0.10.0
libtpu: 0.0.40
codegen_flags: <defaults>
</compile_context>

<pallas_src>
import jax
import jax.numpy as jnp
from jax.experimental import pallas as pl
from jax.experimental.pallas import tpu as pltpu

HIDDEN = 256


def _cdiv(a, b):
    return (a + b - 1) // b


def _round_up(n, m):
    return _cdiv(n, m) * m


def critic_kernel(xt_ref, w1_ref, b1_ref, w2_ref, b2_ref, w3_ref, b3_ref, o_ref):
    """One batch tile, transposed orientation (batch on lanes).

    xt_ref: (state_dim, tb) bf16; w*_ref: PyTorch-layout (out, in) bf16;
    b*_ref: (out, 1) f32; o_ref: (1, tb) f32 lane-dense Q-value row.
    """
    xt = xt_ref[...]
    # fc1 + ReLU: bf16 MXU matmul, f32 accumulation; bias/ReLU on the VPU in f32.
    h1 = jnp.dot(w1_ref[...], xt, preferred_element_type=jnp.float32)
    h1 = jnp.maximum(h1 + b1_ref[...], 0.0)                      # (256, tb) f32
    # fc2 + ReLU
    h2 = jnp.dot(w2_ref[...], h1.astype(jnp.bfloat16),
                 preferred_element_type=jnp.float32)
    h2 = jnp.maximum(h2 + b2_ref[...], 0.0)                      # (256, tb) f32
    # fc3 (256 -> 1): M=1 MXU matmul yields the result directly as a lane-dense
    # (1, tb) row -- no masked (tb, 1) stores, no XLU relayout.
    q = jnp.dot(w3_ref[...], h2.astype(jnp.bfloat16),
                preferred_element_type=jnp.float32) + b3_ref[...]
    o_ref[...] = q.astype(o_ref.dtype)


def critic_forward(x, params, max_tb=2048):
    """x: (B, state_dim) f32 (or bf16). Returns (B, 1) f32 Q-values."""
    B, state_dim = x.shape

    # Batch goes on the lane axis: one small transpose pass in the wrapper, with
    # the bf16 cast folded in (numerically identical to the in-kernel MXU cast,
    # halves x DMA bytes; callers already holding bf16 pay nothing extra).
    xt = x.astype(jnp.bfloat16).T                                # (state_dim, B)

    # Batch tile: as big as useful (amortize ~0.35us per-step overhead), multiple
    # of 128 lanes, but >= 2 grid steps when the batch allows so the "parallel"
    # axis actually shards across both v7x TensorCores.
    if B <= 128:
        tb = B                            # single step; block == full array dims
    else:
        tb = min(max_tb, _round_up(_cdiv(B, 2), 128))
    grid = (_cdiv(B, tb),)                # non-divisible B: boundary block clamped

    # Weights/biases: same block every step -> VMEM-resident; Buffered(1) avoids
    # allocating a useless second pipeline buffer for these revisited operands.
    def resident(shape):
        return pl.BlockSpec(shape, lambda i: (0, 0), pipeline_mode=pl.Buffered(1))

    out_row = pl.pallas_call(
        critic_kernel,
        out_shape=jax.ShapeDtypeStruct((1, B), jnp.float32),
        grid=grid,
        in_specs=[
            pl.BlockSpec((state_dim, tb), lambda i: (0, i)),     # x^T batch tiles
            resident((HIDDEN, state_dim)),                       # W1 (256, sd) bf16
            resident((HIDDEN, 1)),                               # b1 (256, 1) f32
            resident((HIDDEN, HIDDEN)),                          # W2 (256,256) bf16
            resident((HIDDEN, 1)),                               # b2 (256, 1) f32
            resident((1, HIDDEN)),                               # W3 (1, 256) bf16
            resident((1, 1)),                                    # b3 (1, 1) f32
        ],
        out_specs=pl.BlockSpec((1, tb), lambda i: (0, i)),       # lane-dense row
        compiler_params=pltpu.CompilerParams(
            dimension_semantics=("parallel",)),
    )(xt, params["W1"], params["b1"], params["W2"], params["b2"],
      params["W3"], params["b3"])

    return out_row.reshape(B, 1)          # (1, B) -> (B, 1): same element order


def init_params(key, state_dim):
    """nn.Linear-style U(-1/sqrt(fan_in), 1/sqrt(fan_in)) init.

    Weights kept in PyTorch layout (out_features, in_features) and stored bf16
    (MXU dtype, halves weight DMA); biases stay f32 as (out_features, 1) columns.
    """
    ks = jax.random.split(key, 6)

    def linear(kw, kb, fan_in, fan_out):
        bound = 1.0 / jnp.sqrt(jnp.float32(fan_in))
        W = jax.random.uniform(kw, (fan_out, fan_in), jnp.float32, -bound, bound)
        b = jax.random.uniform(kb, (fan_out, 1), jnp.float32, -bound, bound)
        return W, b

    W1, b1 = linear(ks[0], ks[1], state_dim, HIDDEN)
    W2, b2 = linear(ks[2], ks[3], HIDDEN, HIDDEN)
    W3, b3 = linear(ks[4], ks[5], HIDDEN, 1)
    return {
        "W1": W1.astype(jnp.bfloat16), "b1": b1,
        "W2": W2.astype(jnp.bfloat16), "b2": b2,
        "W3": W3.astype(jnp.bfloat16), "b3": b3,
    }


def critic_ref(x, p):
    """Pure-JAX reference mirroring the kernel's numerics exactly
    (bf16 MXU operands, f32 accumulation / bias / ReLU)."""
    xb = x.astype(jnp.bfloat16).astype(jnp.float32)
    w1 = p["W1"].astype(jnp.float32)
    w2 = p["W2"].astype(jnp.float32)
    w3 = p["W3"].astype(jnp.float32)
    h1 = jnp.maximum(xb @ w1.T + p["b1"].T, 0.0)
    h1b = h1.astype(jnp.bfloat16).astype(jnp.float32)
    h2 = jnp.maximum(h1b @ w2.T + p["b2"].T, 0.0)
    h2b = h2.astype(jnp.bfloat16).astype(jnp.float32)
    return h2b @ w3.T + p["b3"].T


if __name__ == "__main__":
    key = jax.random.PRNGKey(0)
    k_param, k_x1, k_x2 = jax.random.split(key, 3)

    state_dim = 16  # e.g. a small gym observation space
    params = init_params(k_param, state_dim)

    # Small batch: single grid step, block == full batch dim.
    x_small = jax.random.normal(k_x1, (8, state_dim), jnp.float32)
    out_small = jax.block_until_ready(critic_forward(x_small, params))
    ref_small = critic_ref(x_small, params)
    assert out_small.shape == (8, 1), out_small.shape
    assert jnp.allclose(out_small, ref_small, atol=1e-4, rtol=1e-4), "small-batch mismatch"

    # Ragged larger batch with a small tile cap: multi-step parallel grid plus a
    # clamped (partial) boundary block -- exercises the no-padding path.
    x_big = jax.random.normal(k_x2, (300, state_dim), jnp.float32)
    out_big = jax.block_until_ready(critic_forward(x_big, params, max_tb=128))
    ref_big = critic_ref(x_big, params)
    assert out_big.shape == (300, 1), out_big.shape
    assert jnp.allclose(out_big, ref_big, atol=1e-4, rtol=1e-4), "big-batch mismatch"

    print("KERNEL_OK")
</pallas_src>

<mosaic_0001>
module attributes {stable_mosaic.version = 11 : i64} {
  func.func @critic_kernel(%arg0: i32, %arg1: memref<16x8xbf16, #tpu.memory_space<vmem>>, %arg2: memref<256x16xbf16, #tpu.memory_space<vmem>>, %arg3: memref<256x1xf32, #tpu.memory_space<vmem>>, %arg4: memref<256x256xbf16, #tpu.memory_space<vmem>>, %arg5: memref<256x1xf32, #tpu.memory_space<vmem>>, %arg6: memref<1x256xbf16, #tpu.memory_space<vmem>>, %arg7: memref<1x1xf32, #tpu.memory_space<vmem>>, %arg8: memref<1x8xf32, #tpu.memory_space<vmem>>) attributes {dimension_semantics = [#tpu.dimension_semantics<parallel>], iteration_bounds = array<i64: 1>, scalar_prefetch = 0 : i64, scratch_operands = 0 : i64, tpu.core_type = #tpu.core_type<tc>, window_params = [{transform_indices = @transform_0, window_bounds = array<i64: 16, 8>}, {pipeline_mode = #tpu.pipeline_mode<synchronous>, transform_indices = @transform_1, window_bounds = array<i64: 256, 16>}, {pipeline_mode = #tpu.pipeline_mode<synchronous>, transform_indices = @transform_2, window_bounds = array<i64: 256, 1>}, {pipeline_mode = #tpu.pipeline_mode<synchronous>, transform_indices = @transform_3, window_bounds = array<i64: 256, 256>}, {pipeline_mode = #tpu.pipeline_mode<synchronous>, transform_indices = @transform_4, window_bounds = array<i64: 256, 1>}, {pipeline_mode = #tpu.pipeline_mode<synchronous>, transform_indices = @transform_5, window_bounds = array<i64: 1, 256>}, {pipeline_mode = #tpu.pipeline_mode<synchronous>, transform_indices = @transform_6, window_bounds = array<i64: 1, 1>}, {transform_indices = @transform_7, window_bounds = array<i64: 1, 8>}]} {
    %c0 = arith.constant 0 : index
    %c0_0 = arith.constant 0 : index
    %0 = vector.load %arg1[%c0, %c0_0] : memref<16x8xbf16, #tpu.memory_space<vmem>>, vector<16x8xbf16>
    %c0_1 = arith.constant 0 : index
    %c0_2 = arith.constant 0 : index
    %1 = vector.load %arg2[%c0_1, %c0_2] : memref<256x16xbf16, #tpu.memory_space<vmem>>, vector<256x16xbf16>
    %cst = arith.constant dense<0.000000e+00> : vector<256x8xf32>
    %2 = tpu.matmul %1, %0, %cst {dimension_numbers = #tpu.dot_dimension_numbers<[1], [0], [0], [1], [0, 0, 1, 1], [], []>} : vector<256x16xbf16>, vector<16x8xbf16>, vector<256x8xf32> -> vector<256x8xf32>
    %c0_3 = arith.constant 0 : index
    %c0_4 = arith.constant 0 : index
    %3 = vector.load %arg3[%c0_3, %c0_4] : memref<256x1xf32, #tpu.memory_space<vmem>>, vector<256x1xf32>
    %4 = vector.broadcast %3 : vector<256x1xf32> to vector<256x8xf32>
    %5 = arith.addf %2, %4 : vector<256x8xf32>
    %cst_5 = arith.constant 0.000000e+00 : f32
    %6 = vector.broadcast %cst_5 : f32 to vector<256x8xf32>
    %7 = arith.maximumf %5, %6 : vector<256x8xf32>
    %c0_6 = arith.constant 0 : index
    %c0_7 = arith.constant 0 : index
    %8 = vector.load %arg4[%c0_6, %c0_7] : memref<256x256xbf16, #tpu.memory_space<vmem>>, vector<256x256xbf16>
    %9 = arith.truncf %7 : vector<256x8xf32> to vector<256x8xbf16>
    %cst_8 = arith.constant dense<0.000000e+00> : vector<256x8xf32>
    %10 = tpu.matmul %8, %9, %cst_8 {dimension_numbers = #tpu.dot_dimension_numbers<[1], [0], [0], [1], [0, 0, 1, 1], [], []>} : vector<256x256xbf16>, vector<256x8xbf16>, vector<256x8xf32> -> vector<256x8xf32>
    %c0_9 = arith.constant 0 : index
    %c0_10 = arith.constant 0 : index
    %11 = vector.load %arg5[%c0_9, %c0_10] : memref<256x1xf32, #tpu.memory_space<vmem>>, vector<256x1xf32>
    %12 = vector.broadcast %11 : vector<256x1xf32> to vector<256x8xf32>
    %13 = arith.addf %10, %12 : vector<256x8xf32>
    %cst_11 = arith.constant 0.000000e+00 : f32
    %14 = vector.broadcast %cst_11 : f32 to vector<256x8xf32>
    %15 = arith.maximumf %13, %14 : vector<256x8xf32>
    %c0_12 = arith.constant 0 : index
    %c0_13 = arith.constant 0 : index
    %16 = vector.load %arg6[%c0_12, %c0_13] : memref<1x256xbf16, #tpu.memory_space<vmem>>, vector<1x256xbf16>
    %17 = arith.truncf %15 : vector<256x8xf32> to vector<256x8xbf16>
    %cst_14 = arith.constant dense<0.000000e+00> : vector<1x8xf32>
    %18 = tpu.matmul %16, %17, %cst_14 {dimension_numbers = #tpu.dot_dimension_numbers<[1], [0], [0], [1], [0, 0, 1, 1], [], []>} : vector<1x256xbf16>, vector<256x8xbf16>, vector<1x8xf32> -> vector<1x8xf32>
    %c0_15 = arith.constant 0 : index
    %c0_16 = arith.constant 0 : index
    %19 = vector.load %arg7[%c0_15, %c0_16] : memref<1x1xf32, #tpu.memory_space<vmem>>, vector<1x1xf32>
    %20 = vector.broadcast %19 : vector<1x1xf32> to vector<1x8xf32>
    %21 = arith.addf %18, %20 : vector<1x8xf32>
    %c0_17 = arith.constant 0 : index
    %c0_18 = arith.constant 0 : index
    %22 = vector.load %arg8[%c0_17, %c0_18] : memref<1x8xf32, #tpu.memory_space<vmem>>, vector<1x8xf32>
    tpu.vector_store %arg8[%c0_17, %c0_18], %21 {strides = array<i32>} : memref<1x8xf32, #tpu.memory_space<vmem>>, vector<1x8xf32>,
    return
  }
  func.func @transform_0(%arg0: i32) -> (i32, i32) {
    %c0_i32 = arith.constant 0 : i32
    %c0_i32_0 = arith.constant 0 : i32
    return %c0_i32, %arg0 : i32, i32
  }
  func.func @transform_1(%arg0: i32) -> (i32, i32) {
    %c0_i32 = arith.constant 0 : i32
    %c0_i32_0 = arith.constant 0 : i32
    %c0_i32_1 = arith.constant 0 : i32
    return %c0_i32, %c0_i32_0 : i32, i32
  }
  func.func @transform_2(%arg0: i32) -> (i32, i32) {
    %c0_i32 = arith.constant 0 : i32
    %c0_i32_0 = arith.constant 0 : i32
    %c0_i32_1 = arith.constant 0 : i32
    return %c0_i32, %c0_i32_0 : i32, i32
  }
  func.func @transform_3(%arg0: i32) -> (i32, i32) {
    %c0_i32 = arith.constant 0 : i32
    %c0_i32_0 = arith.constant 0 : i32
    %c0_i32_1 = arith.constant 0 : i32
    return %c0_i32, %c0_i32_0 : i32, i32
  }
  func.func @transform_4(%arg0: i32) -> (i32, i32) {
    %c0_i32 = arith.constant 0 : i32
    %c0_i32_0 = arith.constant 0 : i32
    %c0_i32_1 = arith.constant 0 : i32
    return %c0_i32, %c0_i32_0 : i32, i32
  }
  func.func @transform_5(%arg0: i32) -> (i32, i32) {
    %c0_i32 = arith.constant 0 : i32
    %c0_i32_0 = arith.constant 0 : i32
    %c0_i32_1 = arith.constant 0 : i32
    return %c0_i32, %c0_i32_0 : i32, i32
  }
  func.func @transform_6(%arg0: i32) -> (i32, i32) {
    %c0_i32 = arith.constant 0 : i32
    %c0_i32_0 = arith.constant 0 : i32
    %c0_i32_1 = arith.constant 0 : i32
    return %c0_i32, %c0_i32_0 : i32, i32
  }
  func.func @transform_7(%arg0: i32) -> (i32, i32) {
    %c0_i32 = arith.constant 0 : i32
    %c0_i32_0 = arith.constant 0 : i32
    return %c0_i32, %arg0 : i32, i32
  }
}

</mosaic_0001>

<bundles_post_ra>
// kernel: tpu_custom_call.1
= control target key start
LH: loop header
LB: loop body
LE: loop exit
PB: predicated region body
PF: predicated region fallthrough
CT: control target
= control target key end

     0   :  { %s2248_s0 = inlined_call_operand.vmem [shape: bf16[16,8], index: 0, kind: input, shape index: {}]   ;;  %s2249_s1 = inlined_call_operand.vmem [shape: bf16[256,16], index: 1, kind: input, shape index: {}]   ;;  %s2250_s2 = inlined_call_operand.vmem [shape: f32[256,1], index: 2, kind: input, shape index: {}]   ;;  %s2251_s3 = inlined_call_operand.vmem [shape: bf16[256,256], index: 3, kind: input, shape index: {}]   ;;  %s2252_s4 = inlined_call_operand.vmem [shape: f32[256,1], index: 4, kind: input, shape index: {}]   ;;  %s2253_s5 = inlined_call_operand.vmem [shape: bf16[1,256], index: 5, kind: input, shape index: {}]   ;;  %s2254_s6 = inlined_call_operand.<no memory space> [shape: f32[1,1], index: 6, kind: input, shape index: {}]   ;;  %s2255_s7 = inlined_call_operand.hbm [shape: f32[1,8], index: 7, kind: output, shape index: {}]  }
   0x1   :  { %v12_v0 = vstv %s2254_s6 }
   0x2   :  { %13 = vst [vmem:[#allocation2] sm:$0x1] %v12_v0 }
   0x3   :  { %v80_v1 = vld [vmem:[%s2250_s2 + $0x80] sm:$0xff]  ;;  %v1646_v3 = vmov 0   ;;  %v81_v5 = vld [vmem:[%s2250_s2 + $0x88] sm:$0xff]  ;;  %vm342_vm0 = vcmask 130048   ;;  %v1560_v9 = vld [vmem:[%s2249_s1 + $0x10] sm:$0xff]  }
   0x4   :  { %v64_v2 = vld [vmem:[%s2250_s2] sm:$0xff]  ;;  %1556 = vset.pattern.permute.xlu1 %v1646_v3  ;;  %1555 = vset.pattern.permute.xlu0 %v1646_v3  ;;  %v65_v6 = vld [vmem:[%s2250_s2 + $0x8] sm:$0xff]  ;;  %v82_v10 = vld [vmem:[%s2250_s2 + $0x90] sm:$0xff] }
   0x5   :  { %v1557_v4 = vld [vmem:[%s2248_s0] sm:$0xff]   ;;  %178 = vperm.xlu0 %1555, %v80_v1   ;;  %98 = vperm.xlu1 %1556, %v64_v2   ;;  %v1559_v8 = vld [vmem:[%s2249_s1 + $0x8] sm:$0xff]   ;;  %v83_v11 = vld [vmem:[%s2250_s2 + $0x98] sm:$0xff] }
   0x6   :  { %1502 = vmatprep.subr.bf16.mxu0 %v1557_v4  ;;  %v1558_v7 = vld [vmem:[%s2249_s1] sm:$0xff]   ;;  %v66_v12 = vld [vmem:[%s2250_s2 + $0x10] sm:$0xff]  ;;  %v67_v13 = vld [vmem:[%s2250_s2 + $0x18] sm:$0xff] }
   0x7   :  { %1503 = vmatpush3.bf16.msra.mxu0 %v1557_v4  ;;  %1504 = vmatprep.mubr.msk.bf16.mxu0 %vm342_vm0, %v1558_v7  ;;  %v1561_v14 = vld [vmem:[%s2249_s1 + $0x18] sm:$0xff]   ;;  %v1562_v15 = vld [vmem:[%s2249_s1 + $0x20] sm:$0xff]   ;;  %v85_v17 = vld [vmem:[%s2250_s2 + $0xa8] sm:$0xff] }
   0x8   :  { %v84_v16 = vld [vmem:[%s2250_s2 + $0xa0] sm:$0xff]  ;;  %v69_v19 = vld [vmem:[%s2250_s2 + $0x28] sm:$0xff]  ;;  %v1564_v21 = vld [vmem:[%s2249_s1 + $0x30] sm:$0xff]  }
   0x9   :  { %183 = vperm.xlu0 %1555, %v81_v5   ;;  %103 = vperm.xlu1 %1556, %v65_v6   ;;  %v68_v18 = vld [vmem:[%s2250_s2 + $0x20] sm:$0xff]  ;;  %v1563_v20 = vld [vmem:[%s2249_s1 + $0x28] sm:$0xff]   ;;  %v86_v22 = vld [vmem:[%s2250_s2 + $0xb0] sm:$0xff] }
   0xa   :  { %1505 = vmatmul.mubr.msk.bf16.vlgmr.msra.gmra.mrb[0].mxu0 %vm342_vm0, %v1559_v8  ;;  %v87_v23 = vld [vmem:[%s2250_s2 + $0xb8] sm:$0xff]  ;;  %v70_v24 = vld [vmem:[%s2250_s2 + $0x30] sm:$0xff]  ;;  %v1566_v27 = vld [vmem:[%s2249_s1 + $0x40] sm:$0xff]  }
   0xb   :  { %1508 = vmatprep.mubr.msk.bf16.mxu0 %vm342_vm0, %v1560_v9  ;;  %v71_v25 = vld [vmem:[%s2250_s2 + $0x38] sm:$0xff]  ;;  %v88_v28 = vld [vmem:[%s2250_s2 + $0xc0] sm:$0xff]  ;;  %v89_v29 = vld [vmem:[%s2250_s2 + $0xc8] sm:$0xff] }
   0xc   :  { %v1565_v26 = vld [vmem:[%s2249_s1 + $0x38] sm:$0xff]   ;;  %v72_v30 = vld [vmem:[%s2250_s2 + $0x40] sm:$0xff]  ;;  %v73_v31 = vld [vmem:[%s2250_s2 + $0x48] sm:$0xff] }
   0xd   :  { %188 = vperm.xlu0 %1555, %v82_v10   ;;  %193 = vperm.xlu1 %1556, %v83_v11   ;;  %v1567_v32 = vld [vmem:[%s2249_s1 + $0x48] sm:$0xff]   ;;  %v1568_v33 = vld [vmem:[%s2249_s1 + $0x50] sm:$0xff]   ;;  %v91_v35 = vld [vmem:[%s2250_s2 + $0xd8] sm:$0xff] }
   0xe   :  { %v90_v34 = vld [vmem:[%s2250_s2 + $0xd0] sm:$0xff]  ;;  %v75_v37 = vld [vmem:[%s2250_s2 + $0x58] sm:$0xff]  ;;  %v1570_v39 = vld [vmem:[%s2249_s1 + $0x60] sm:$0xff]  }
   0xf   :  { %v74_v36 = vld [vmem:[%s2250_s2 + $0x50] sm:$0xff]  ;;  %v1569_v38 = vld [vmem:[%s2249_s1 + $0x58] sm:$0xff]   ;;  %v92_v40 = vld [vmem:[%s2250_s2 + $0xe0] sm:$0xff] }
  0x10   :  { %v93_v41 = vld [vmem:[%s2250_s2 + $0xe8] sm:$0xff] }
  0x11   :  { %108 = vperm.xlu0 %1555, %v66_v12   ;;  %113 = vperm.xlu1 %1556, %v67_v13  }
  0x12   :  { %1509 = vmatmul.mubr.msk.bf16.gmra.mrb[4].mxu0 %vm342_vm0, %v1561_v14 }
  0x13   :  { %1512 = vmatprep.mubr.msk.bf16.mxu0 %vm342_vm0, %v1562_v15 }
  0x15   :  { %198 = vperm.xlu0 %1555, %v84_v16   ;;  %203 = vperm.xlu1 %1556, %v85_v17  }
  0x19   :  { %118 = vperm.xlu0 %1555, %v68_v18   ;;  %123 = vperm.xlu1 %1556, %v69_v19  }
  0x1a   :  { %1513 = vmatmul.mubr.msk.bf16.gmra.mrb[8].mxu0 %vm342_vm0, %v1563_v20 }
  0x1b   :  { %1516 = vmatprep.mubr.msk.bf16.mxu0 %vm342_vm0, %v1564_v21 }
  0x1d   :  { %208 = vperm.xlu0 %1555, %v86_v22   ;;  %213 = vperm.xlu1 %1556, %v87_v23  }
  0x21   :  { %128 = vperm.xlu0 %1555, %v70_v24   ;;  %133 = vperm.xlu1 %1556, %v71_v25  }
  0x22   :  { %1517 = vmatmul.mubr.msk.bf16.gmra.mrb[12].mxu0 %vm342_vm0, %v1565_v26 }
  0x23   :  { %1520 = vmatprep.mubr.msk.bf16.mxu0 %vm342_vm0, %v1566_v27 }
  0x25   :  { %218 = vperm.xlu0 %1555, %v88_v28   ;;  %223 = vperm.xlu1 %1556, %v89_v29  }
  0x29   :  { %138 = vperm.xlu0 %1555, %v72_v30   ;;  %143 = vperm.xlu1 %1556, %v73_v31  }
  0x2a   :  { %1521 = vmatmul.mubr.msk.bf16.gmra.mrb[16].mxu0 %vm342_vm0, %v1567_v32 }
  0x2b   :  { %1524 = vmatprep.mubr.msk.bf16.mxu0 %vm342_vm0, %v1568_v33 }
  0x2d   :  { %228 = vperm.xlu0 %1555, %v90_v34   ;;  %233 = vperm.xlu1 %1556, %v91_v35  }
  0x31   :  { %148 = vperm.xlu0 %1555, %v74_v36   ;;  %153 = vperm.xlu1 %1556, %v75_v37  }
  0x32   :  { %1525 = vmatmul.mubr.msk.bf16.gmra.mrb[20].mxu0 %vm342_vm0, %v1569_v38 }
  0x33   :  { %1528 = vmatprep.mubr.msk.bf16.mxu0 %vm342_vm0, %v1570_v39 }
  0x34   :  { %14 = vsyncpa [#allocation4], 0  ;;  %v76_v42 = vld [vmem:[%s2250_s2 + $0x60] sm:$0xff]  ;;  %v77_v43 = vld [vmem:[%s2250_s2 + $0x68] sm:$0xff]  ;;  %vm1269_vm1 = vcmask 57344  }
  0x35   :  { %238 = vperm.xlu0 %1555, %v92_v40   ;;  %243 = vperm.xlu1 %1556, %v93_v41   ;;  %v1571_v44 = vld [vmem:[%s2249_s1 + $0x68] sm:$0xff]   ;;  %v1572_v45 = vld [vmem:[%s2249_s1 + $0x70] sm:$0xff]   ;;  %v95_v47 = vld [vmem:[%s2250_s2 + $0xf8] sm:$0xff] }
  0x36   :  { %v94_v46 = vld [vmem:[%s2250_s2 + $0xf0] sm:$0xff]  ;;  %v79_v49 = vld [vmem:[%s2250_s2 + $0x78] sm:$0xff]  ;;  %v648_v51 = vld [vmem:[%s2252_s4 + $0x80] sm:$0xff] }
  0x37   :  { %v78_v48 = vld [vmem:[%s2250_s2 + $0x70] sm:$0xff]  ;;  %v1573_v50 = vld [vmem:[%s2249_s1 + $0x78] sm:$0xff]   ;;  %v649_v52 = vld [vmem:[%s2252_s4 + $0x88] sm:$0xff] }
  0x38   :  { %v632_v53 = vld [vmem:[%s2252_s4] sm:$0xff]  ;;  %v633_v54 = vld [vmem:[%s2252_s4 + $0x8] sm:$0xff]  ;;  %v650_v55 = vld [vmem:[%s2252_s4 + $0x90] sm:$0xff] }
  0x39   :  { %158 = vperm.xlu0 %1555, %v76_v42   ;;  %163 = vperm.xlu1 %1556, %v77_v43   ;;  %v651_v56 = vld [vmem:[%s2252_s4 + $0x98] sm:$0xff]  ;;  %v634_v57 = vld [vmem:[%s2252_s4 + $0x10] sm:$0xff]  ;;  %v652_v59 = vld [vmem:[%s2252_s4 + $0xa0] sm:$0xff] }
  0x3a   :  { %1529 = vmatmul.mubr.msk.bf16.gmra.mrb[24].mxu0 %vm342_vm0, %v1571_v44  ;;  %v635_v58 = vld [vmem:[%s2252_s4 + $0x18] sm:$0xff]  ;;  %v653_v60 = vld [vmem:[%s2252_s4 + $0xa8] sm:$0xff]  ;;  %v636_v61 = vld [vmem:[%s2252_s4 + $0x20] sm:$0xff] }
  0x3b   :  { %1532 = vmatprep.mubr.msk.bf16.mxu0 %vm342_vm0, %v1572_v45  ;;  %v637_v62 = vld [vmem:[%s2252_s4 + $0x28] sm:$0xff]  ;;  %v654_v63 = vld [vmem:[%s2252_s4 + $0xb0] sm:$0xff]  ;;  %v655_v0 = vld [vmem:[%s2252_s4 + $0xb8] sm:$0xff] }
  0x3c   :  { %v638_v1 = vld [vmem:[%s2252_s4 + $0x30] sm:$0xff]  ;;  %v639_v2 = vld [vmem:[%s2252_s4 + $0x38] sm:$0xff]  ;;  %v656_v3 = vld [vmem:[%s2252_s4 + $0xc0] sm:$0xff] }
  0x3d   :  { %248 = vperm.xlu0 %1555, %v94_v46   ;;  %253 = vperm.xlu1 %1556, %v95_v47   ;;  %v657_v4 = vld [vmem:[%s2252_s4 + $0xc8] sm:$0xff]  ;;  %v640_v5 = vld [vmem:[%s2252_s4 + $0x40] sm:$0xff]  ;;  %v658_v7 = vld [vmem:[%s2252_s4 + $0xd0] sm:$0xff] }
  0x3e   :  { %v641_v6 = vld [vmem:[%s2252_s4 + $0x48] sm:$0xff]  ;;  %v659_v8 = vld [vmem:[%s2252_s4 + $0xd8] sm:$0xff]  ;;  %v642_v9 = vld [vmem:[%s2252_s4 + $0x50] sm:$0xff] }
  0x3f   :  { %v643_v10 = vld [vmem:[%s2252_s4 + $0x58] sm:$0xff]  ;;  %v660_v11 = vld [vmem:[%s2252_s4 + $0xe0] sm:$0xff]  ;;  %v661_v12 = vld [vmem:[%s2252_s4 + $0xe8] sm:$0xff] }
  0x40   :  { %v644_v13 = vld [vmem:[%s2252_s4 + $0x60] sm:$0xff]  ;;  %v645_v14 = vld [vmem:[%s2252_s4 + $0x68] sm:$0xff]  ;;  %v662_v15 = vld [vmem:[%s2252_s4 + $0xf0] sm:$0xff] }
  0x41   :  { %168 = vperm.xlu0 %1555, %v78_v48   ;;  %173 = vperm.xlu1 %1556, %v79_v49   ;;  %v663_v16 = vld [vmem:[%s2252_s4 + $0xf8] sm:$0xff]  ;;  %v646_v17 = vld [vmem:[%s2252_s4 + $0x70] sm:$0xff]  ;;  %v1194_v19 = vld [vmem:[#allocation2] sm:$0x1] }
  0x42   :  { %1533 = vmatmul.mubr.msk.bf16.gmra.mrb[28].mxu0 %vm342_vm0, %v1573_v50  ;;  %v647_v18 = vld [vmem:[%s2252_s4 + $0x78] sm:$0xff]  ;;  %v1576_v24 = vld [vmem:[%s2251_s3 + $0x4] ss:$8 sps:$4 sm:$0xff]  }
  0x43   :  { %v1579_v25 = vld [vmem:[%s2251_s3 + $0x54] ss:$8 sps:$4 sm:$0xff]   ;;  %1016 = vmatprep.mubr.bf16.mxu0 %v1576_v24 }
  0x44   :  { %1056 = vmatprep.mubr.bf16.mxu1 %v1579_v25 }
  0x45   :  { %746 = vperm.xlu0 %1555, %v648_v51   ;;  %751 = vperm.xlu1 %1556, %v649_v52  }
  0x49   :  { %666 = vperm.xlu0 %1555, %v632_v53   ;;  %671 = vperm.xlu1 %1556, %v633_v54  }
  0x4d   :  { %756 = vperm.xlu0 %1555, %v650_v55   ;;  %761 = vperm.xlu1 %1556, %v651_v56  }
  0x51   :  { %676 = vperm.xlu0 %1555, %v634_v57   ;;  %681 = vperm.xlu1 %1556, %v635_v58  }
  0x55   :  { %766 = vperm.xlu0 %1555, %v652_v59   ;;  %771 = vperm.xlu1 %1556, %v653_v60  }
  0x59   :  { %686 = vperm.xlu0 %1555, %v636_v61   ;;  %691 = vperm.xlu1 %1556, %v637_v62  }
  0x5d   :  { %776 = vperm.xlu0 %1555, %v654_v63   ;;  %781 = vperm.xlu1 %1556, %v655_v0  }
  0x61   :  { %696 = vperm.xlu0 %1555, %v638_v1   ;;  %701 = vperm.xlu1 %1556, %v639_v2  }
  0x65   :  { %786 = vperm.xlu0 %1555, %v656_v3   ;;  %791 = vperm.xlu1 %1556, %v657_v4  }
  0x69   :  { %706 = vperm.xlu0 %1555, %v640_v5   ;;  %711 = vperm.xlu1 %1556, %v641_v6  }
  0x6d   :  { %796 = vperm.xlu0 %1555, %v658_v7   ;;  %801 = vperm.xlu1 %1556, %v659_v8  }
  0x71   :  { %716 = vperm.xlu0 %1555, %v642_v9   ;;  %721 = vperm.xlu1 %1556, %v643_v10  }
  0x75   :  { %806 = vperm.xlu0 %1555, %v660_v11   ;;  %811 = vperm.xlu1 %1556, %v661_v12  }
  0x79   :  { %726 = vperm.xlu0 %1555, %v644_v13   ;;  %731 = vperm.xlu1 %1556, %v645_v14  }
  0x7d   :  { %816 = vperm.xlu0 %1555, %v662_v15   ;;  %821 = vperm.xlu1 %1556, %v663_v16  }
  0x81   :  { %736 = vperm.xlu0 %1555, %v646_v17   ;;  %741 = vperm.xlu1 %1556, %v647_v18  }
  0x84   :  { %v1951_v20 = vpop.permute.xlu0 %178  ;;  %v99_v21 = vpop.permute.xlu1 %98 }
  0x85   :  { %1197 = vperm.xlu0 %1555, %v1194_v19  }
  0x88   :  { %v1953_v22 = vpop.permute.xlu0 %183  ;;  %v104_v23 = vpop.permute.xlu1 %103 }
  0x8c   :  { %v1961_v26 = vpop.permute.xlu0 %188  ;;  %v1963_v27 = vpop.permute.xlu1 %193 }
  0x90   :  { %v109_v28 = vpop.permute.xlu0 %108  ;;  %v114_v29 = vpop.permute.xlu1 %113 }
  0x94   :  { %v1965_v30 = vpop.permute.xlu0 %198  ;;  %v1967_v31 = vpop.permute.xlu1 %203 }
  0x98   :  { %v119_v32 = vpop.permute.xlu0 %118  ;;  %v124_v33 = vpop.permute.xlu1 %123 }
  0x9c   :  { %v1969_v34 = vpop.permute.xlu0 %208  ;;  %v1971_v35 = vpop.permute.xlu1 %213 }
  0xa0   :  { %v129_v36 = vpop.permute.xlu0 %128  ;;  %v134_v37 = vpop.permute.xlu1 %133 }
  0xa4   :  { %v1973_v38 = vpop.permute.xlu0 %218  ;;  %v1975_v39 = vpop.permute.xlu1 %223 }
  0xa8   :  { %v139_v40 = vpop.permute.xlu0 %138  ;;  %v144_v41 = vpop.permute.xlu1 %143 }
  0xac   :  { %v1977_v42 = vpop.permute.xlu0 %228  ;;  %v1979_v43 = vpop.permute.xlu1 %233 }
  0xb0   :  { %v149_v44 = vpop.permute.xlu0 %148  ;;  %v154_v48 = vpop.permute.xlu1 %153 }
  0xb4   :  { %v1981_v56 = vpop.permute.xlu0 %238  ;;  %v1985_v60 = vpop.permute.xlu1 %243 }
  0xb8   :  { %v159_v4 = vpop.permute.xlu0 %158  ;;  %v164_v9 = vpop.permute.xlu1 %163 }
  0xbc   :  { %v1993_v17 = vpop.permute.xlu0 %248 }
  0xdd   :  { %v1506_v45 = vpop.f32.mrb[0].mxu0 }
  0xde   :  { %v434_v46 = vadd.f32 %v1506_v45, %v109_v28  ;;  %v425_v47 = vpop.f32.mrb[1].mxu0 }
  0xdf   :  { %v1507_v49 = vpop.f32.mrb[2].mxu0  ;;  %v426_v50 = vadd.f32 %v425_v47, %v99_v21 }
  0xe0   :  { %v437_v51 = vadd.f32 %v1507_v49, %v114_v29  ;;  %v428_v52 = vpop.f32.mrb[3].mxu0  ;;  %v554_v53 = vmax.f32 %v434_v46, 0.0 }
  0xe1   :  { %v429_v55 = vadd.f32 %v428_v52, %v104_v23  ;;  %v552_v57 = vmax.f32 %v426_v50, 0.0  ;;  %v1995_v23 = vpop.permute.xlu1 %253 }
  0xe2   :  { %v555_v54 = vmax.f32 %v437_v51, 0.0 }
  0xe3   :  { %v553_v59 = vmax.f32 %v429_v55, 0.0 }
  0xe4   :  { %v1983_v58 = vpack.c.bf16 %v555_v54, %v554_v53 }
  0xe5   :  { %v1510_v61 = vpop.f32.mrb[4].mxu0  ;;  %v1987_v62 = vpack.c.bf16 %v553_v59, %v552_v57  ;;  %v174_v49 = vpop.permute.xlu1 %173 }
  0xe6   :  { %v450_v63 = vadd.f32 %v1510_v61, %v129_v36  ;;  %v441_v0 = vpop.f32.mrb[5].mxu0 }
  0xe7   :  { %v1511_v1 = vpop.f32.mrb[6].mxu0  ;;  %v442_v2 = vadd.f32 %v441_v0, %v119_v32 }
  0xe8   :  { %v453_v3 = vadd.f32 %v1511_v1, %v134_v37  ;;  %v444_v5 = vpop.f32.mrb[7].mxu0  ;;  %v558_v6 = vmax.f32 %v450_v63, 0.0  ;;  %v169_v37 = vpop.permute.xlu0 %168 }
  0xe9   :  { %v445_v8 = vadd.f32 %v444_v5, %v124_v33  ;;  %v556_v10 = vmax.f32 %v442_v2, 0.0 }
  0xea   :  { %v559_v7 = vmax.f32 %v453_v3, 0.0 }
  0xeb   :  { %v557_v12 = vmax.f32 %v445_v8, 0.0 }
  0xec   :  { %v1989_v11 = vpack.c.bf16 %v559_v7, %v558_v6 }
  0xed   :  { %v1514_v13 = vpop.f32.mrb[8].mxu0  ;;  %v1991_v14 = vpack.c.bf16 %v557_v12, %v556_v10 }
  0xee   :  { %v466_v15 = vadd.f32 %v1514_v13, %v149_v44  ;;  %v457_v16 = vpop.f32.mrb[9].mxu0 }
  0xef   :  { %v1515_v18 = vpop.f32.mrb[10].mxu0  ;;  %v458_v19 = vadd.f32 %v457_v16, %v139_v40 }
  0xf0   :  { %v469_v21 = vadd.f32 %v1515_v18, %v154_v48  ;;  %v460_v24 = vpop.f32.mrb[11].mxu0  ;;  %v562_v25 = vmax.f32 %v466_v15, 0.0 }
  0xf1   :  { %v461_v29 = vadd.f32 %v460_v24, %v144_v41  ;;  %v560_v32 = vmax.f32 %v458_v19, 0.0 }
  0xf2   :  { %v563_v28 = vmax.f32 %v469_v21, 0.0 }
  0xf3   :  { %v561_v36 = vmax.f32 %v461_v29, 0.0 }
  0xf4   :  { %v1997_v33 = vpack.c.bf16 %v563_v28, %v562_v25 }
  0xf5   :  { %v1518_v45 = vpop.f32.mrb[12].mxu0  ;;  %v1999_v46 = vpack.c.bf16 %v561_v36, %v560_v32 }
  0xf6   :  { %v482_v44 = vadd.f32 %v1518_v45, %v169_v37  ;;  %v473_v47 = vpop.f32.mrb[13].mxu0 }
  0xf7   :  { %v1519_v50 = vpop.f32.mrb[14].mxu0  ;;  %v474_v40 = vadd.f32 %v473_v47, %v159_v4 }
  0xf8   :  { %v485_v48 = vadd.f32 %v1519_v50, %v174_v49  ;;  %v476_v51 = vpop.f32.mrb[15].mxu0  ;;  %v566_v52 = vmax.f32 %v482_v44, 0.0 }
  0xf9   :  { %v477_v54 = vadd.f32 %v476_v51, %v164_v9  ;;  %v564_v55 = vmax.f32 %v474_v40, 0.0 }
  0xfa   :  { %v567_v53 = vmax.f32 %v485_v48, 0.0 }
  0xfb   :  { %v565_v57 = vmax.f32 %v477_v54, 0.0 }
  0xfc   :  { %v2001_v41 = vpack.c.bf16 %v567_v53, %v566_v52 }
  0xfd   :  { %v1522_v59 = vpop.f32.mrb[16].mxu0  ;;  %v2003_v61 = vpack.c.bf16 %v565_v57, %v564_v55  ;;  %v1584_v55 = vld [vmem:[%s2251_s3 + $0x10] ss:$8 sps:$4 sm:$0xff]   ;;  %v1586_v57 = vld [vmem:[%s2251_s3 + $0x24] ss:$8 sps:$4 sm:$0xff]  }
  0xfe   :  { %v498_v63 = vadd.f32 %v1522_v59, %v1961_v26  ;;  %v489_v0 = vpop.f32.mrb[17].mxu0  ;;  %v1588_v59 = vld [vmem:[%s2251_s3 + $0x74] ss:$8 sps:$4 sm:$0xff]  }
  0xff   :  { %v1523_v1 = vpop.f32.mrb[18].mxu0  ;;  %v490_v2 = vadd.f32 %v489_v0, %v1951_v20  ;;  %v1592_v0 = vld [vmem:[%s2251_s3 + $0x34] ss:$8 sps:$4 sm:$0xff]  }
 0x100   :  { %v501_v3 = vadd.f32 %v1523_v1, %v1963_v27  ;;  %v492_v4 = vpop.f32.mrb[19].mxu0  ;;  %v570_v5 = vmax.f32 %v498_v63, 0.0  ;;  %v1591_v63 = vld [vmem:[%s2251_s3 + $0x70] ss:$8 sps:$4 sm:$0xff]   ;;  %v1594_v1 = vld [vmem:[%s2251_s3 + $0x84] ss:$8 sps:$4 sm:$0xff]  }
 0x101   :  { %v493_v7 = vadd.f32 %v492_v4, %v1953_v22  ;;  %v568_v8 = vmax.f32 %v490_v2, 0.0  ;;  %v1596_v2 = vld [vmem:[%s2251_s3 + $0x30] ss:$8 sps:$4 sm:$0xff]   ;;  %v1598_v4 = vld [vmem:[%s2251_s3 + $0x44] ss:$8 sps:$4 sm:$0xff]  }
 0x102   :  { %v571_v6 = vmax.f32 %v501_v3, 0.0  ;;  %v1597_v3 = vld [vmem:[%s2251_s3 + $0x80] ss:$8 sps:$4 sm:$0xff]  }
 0x103   :  { %v569_v10 = vmax.f32 %v493_v7, 0.0  ;;  %v1603_v7 = vld [vmem:[%s2251_s3 + $0x90] ss:$8 sps:$4 sm:$0xff]  }
 0x104   :  { %v625_v9 = vpack.c.bf16 %v571_v6, %v570_v5  ;;  %v1600_v5 = vld [vmem:[%s2251_s3 + $0x94] ss:$8 sps:$4 sm:$0xff]   ;;  %v1602_v6 = vld [vmem:[%s2251_s3 + $0x40] ss:$8 sps:$4 sm:$0xff]  }
 0x105   :  { %v1526_v12 = vpop.f32.mrb[20].mxu0  ;;  %v624_v13 = vpack.c.bf16 %v569_v10, %v568_v8  ;;  %v1604_v8 = vld [vmem:[%s2251_s3 + $0xa4] ss:$8 sps:$4 sm:$0xff]   ;;  %v1607_v10 = vld [vmem:[%s2251_s3 + $0xb4] ss:$8 sps:$4 sm:$0xff]  }
 0x106   :  { %v514_v15 = vadd.f32 %v1526_v12, %v1969_v34  ;;  %v505_v16 = vpop.f32.mrb[21].mxu0  ;;  %v1609_v12 = vld [vmem:[%s2251_s3 + $0xb0] ss:$8 sps:$4 sm:$0xff]  }
 0x107   :  { %v506_v26 = vadd.f32 %v505_v16, %v1965_v30  ;;  %v1527_v18 = vpop.f32.mrb[22].mxu0  ;;  %1368 = vmatprep.subr.bf16.mxu0 %v624_v13  ;;  %1536 = vmatprep.subr.bf16.mxu1 %v624_v13  ;;  %v1610_v13 = vld [vmem:[%s2251_s3 + $0xc4] ss:$8 sps:$4 sm:$0xff]   ;;  %v1613_v16 = vld [vmem:[%s2251_s3 + $0xd4] ss:$8 sps:$4 sm:$0xff]  }
 0x108   :  { %v517_v20 = vadd.f32 %v1527_v18, %v1971_v35  ;;  %v508_v27 = vpop.f32.mrb[23].mxu0  ;;  %1369 = vmatpush3.bf16.msra.mxu0 %v1987_v62  ;;  %1544 = vmatpush3.bf16.msra.mxu1 %v1987_v62  ;;  %v574_v22 = vmax.f32 %v514_v15, 0.0  ;;  %v1612_v15 = vld [vmem:[%s2251_s3 + $0xc0] ss:$8 sps:$4 sm:$0xff]   ;;  %v1616_v18 = vld [vmem:[%s2251_s3 + $0xe4] ss:$8 sps:$4 sm:$0xff]  }
 0x109   :  { %v509_v19 = vadd.f32 %v508_v27, %v1967_v31  ;;  %1370 = vmatprep.subr.bf16.mxu0 %v625_v9  ;;  %1537 = vmatprep.subr.bf16.mxu1 %v625_v9  ;;  %v572_v34 = vmax.f32 %v506_v26, 0.0  ;;  %v1606_v9 = vld [vmem:[%s2251_s3 + $0xa0] ss:$8 sps:$4 sm:$0xff]   ;;  %v1615_v26 = vld [vmem:[%s2251_s3 + $0xd0] ss:$8 sps:$4 sm:$0xff]  }
 0x10a   :  { %v575_v21 = vmax.f32 %v517_v20, 0.0  ;;  %v1618_v20 = vld [vmem:[%s2251_s3 + $0xe0] ss:$8 sps:$4 sm:$0xff]   ;;  %v1619_v27 = vld [vmem:[%s2251_s3 + $0xf4] ss:$8 sps:$4 sm:$0xff]  }
 0x10b   :  { %v573_v24 = vmax.f32 %v509_v19, 0.0  ;;  %v1621_v19 = vld [vmem:[%s2251_s3 + $0xf0] ss:$8 sps:$4 sm:$0xff]  }
 0x10c   :  { %v627_v25 = vpack.c.bf16 %v575_v21, %v574_v22  ;;  %1371 = vmatpush3.bf16.msra.mxu0 %v1983_v58  ;;  %1545 = vmatpush3.bf16.msra.mxu1 %v1983_v58  ;;  %v2127_v22 = vpop.permute.xlu0 %746  ;;  %v2129_v21 = vpop.permute.xlu1 %751 }
 0x10d   :  { %v626_v30 = vpack.c.bf16 %v573_v24, %v572_v34  ;;  %v1530_v35 = vpop.f32.mrb[24].mxu0 }
 0x10e   :  { %v530_v28 = vadd.f32 %v1530_v35, %v1977_v42  ;;  %v521_v31 = vpop.f32.mrb[25].mxu0 }
 0x10f   :  { %v522_v29 = vadd.f32 %v521_v31, %v1973_v38  ;;  %v1531_v32 = vpop.f32.mrb[26].mxu0  ;;  %1372 = vmatprep.subr.bf16.mxu0 %v626_v30  ;;  %1538 = vmatprep.subr.bf16.mxu1 %v626_v30 }
 0x110   :  { %v533_v62 = vadd.f32 %v1531_v32, %v1979_v43  ;;  %v524_v36 = vpop.f32.mrb[27].mxu0  ;;  %1373 = vmatpush3.bf16.msra.mxu0 %v1991_v14  ;;  %1546 = vmatpush3.bf16.msra.mxu1 %v1991_v14  ;;  %v578_v45 = vmax.f32 %v530_v28, 0.0  ;;  %v667_v34 = vpop.permute.xlu0 %666 }
 0x111   :  { %v525_v37 = vadd.f32 %v524_v36, %v1975_v39  ;;  %1374 = vmatprep.subr.bf16.mxu0 %v627_v25  ;;  %1539 = vmatprep.subr.bf16.mxu1 %v627_v25  ;;  %v576_v42 = vmax.f32 %v522_v29, 0.0  ;;  %v672_v24 = vpop.permute.xlu1 %671 }
 0x112   :  { %v579_v58 = vmax.f32 %v533_v62, 0.0 }
 0x113   :  { %v577_v44 = vmax.f32 %v525_v37, 0.0  ;;  %v1200_v37 = vlaneseq }
 0x114   :  { %v629_v47 = vpack.c.bf16 %v579_v58, %v578_v45  ;;  %1375 = vmatpush3.bf16.msra.mxu0 %v1989_v11  ;;  %1547 = vmatpush3.bf16.msra.mxu1 %v1989_v11  ;;  %v2131_v25 = vpop.permute.xlu0 %756  ;;  %v1647_v45 = vmov 1966171168  }
 0x115   :  { %v628_v38 = vpack.c.bf16 %v577_v44, %v576_v42  ;;  %v1534_v43 = vpop.f32.mrb[28].mxu0  ;;  %v2133_v30 = vpop.permute.xlu1 %761  ;;  %v1214_v58 = vunpack.c.l.s4 %v1647_v45  ;;  %v2149_v42 = vshrl.u32 %v1200_v37, 7 }
 0x116   :  { %v546_v49 = vadd.f32 %v1534_v43, %v1993_v17  ;;  %v537_v39 = vpop.f32.mrb[29].mxu0 }
 0x117   :  { %v538_v50 = vadd.f32 %v537_v39, %v1981_v56  ;;  %v1535_v40 = vpop.f32.mrb[30].mxu0  ;;  %1376 = vmatprep.subr.bf16.mxu0 %v628_v38  ;;  %1540 = vmatprep.subr.bf16.mxu1 %v628_v38  ;;  %v1215_v44 = vunpack.c.0.s8 %v1214_v58 }
 0x118   :  { %v549_v14 = vadd.f32 %v1535_v40, %v1995_v23  ;;  %v540_v48 = vpop.f32.mrb[31].mxu0  ;;  %1377 = vmatpush3.bf16.msra.mxu0 %v1999_v46  ;;  %1548 = vmatpush3.bf16.msra.mxu1 %v1999_v46  ;;  %v582_v52 = vmax.f32 %v546_v49, 0.0  ;;  %v1577_v23 = vld [vmem:[%s2251_s3 + $0x50] ss:$8 sps:$4 sm:$0xff]   ;;  %v1582_v46 = vld [vmem:[%s2251_s3 + $0x64] ss:$8 sps:$4 sm:$0xff]   ;;  %v2135_v35 = vpop.permute.xlu0 %676 }
 0x119   :  { %v541_v51 = vadd.f32 %v540_v48, %v1985_v60  ;;  %1378 = vmatprep.subr.bf16.mxu0 %v629_v47  ;;  %1541 = vmatprep.subr.bf16.mxu1 %v629_v47  ;;  %v580_v17 = vmax.f32 %v538_v50, 0.0  ;;  %v1574_v60 = vld [vmem:[%s2251_s3] ss:$8 sps:$4 sm:$0xff]   ;;  %v2137_v28 = vpop.permute.xlu1 %681  ;;  %v2163_v39 = vsub.s32 %v1215_v44, %v2149_v42 }
 0x11a   :  { %v583_v11 = vmax.f32 %v549_v14, 0.0  ;;  %v2154_v47 = vld.sshfl [vmem:[%s2253_s5] sm:$0x11 pattern:$0x75316420]  ;;  %s1648_s5 = smov [#allocation3]  }
 0x11b   :  { %v581_v53 = vmax.f32 %v541_v51, 0.0  ;;  %v1212_v49 = vcombine.high %v2154_v47, %v2154_v47  ;;  %v1219_v50 = vrot.slane %v2154_v47, %v2163_v39  ;;  %s1277_s0 = sshll.u32 %s1648_s5, 4  ;;  %s1278_s0 = int_to_ptr.vmem [resolvable:$true] %s1277_s0 }
 0x11c   :  { %v631_v54 = vpack.c.bf16 %v583_v11, %v582_v52  ;;  %1379 = vmatpush3.bf16.msra.mxu0 %v1997_v33  ;;  %1549 = vmatpush3.bf16.msra.mxu1 %v1997_v33  ;;  %v1580_v33 = vld [vmem:[%s2251_s3 + $0x14] ss:$8 sps:$4 sm:$0xff]   ;;  %v2139_v31 = vpop.permute.xlu0 %766  ;;  %s1622_s16 = scalar_lea.vmem %s1278_s0, 16  ;;  %s1626_s17 = scalar_lea.vmem %s1278_s0, 32 }
 0x11d   :  { %v630_v56 = vpack.c.bf16 %v581_v53, %v580_v17  ;;  %v2141_v29 = vpop.permute.xlu1 %771  ;;  %v1226_v40 = vrot.slane %v1212_v49, %v2163_v39  ;;  %p1623_p0 = scmp.ne.s32.totalorder %s1278_s0, %s1622_s16  ;;  %p1627_p1 = scmp.lt.s32.totalorder %s1278_s0, %s1278_s0 }
 0x11e   :  { %p1628_p2 = scmp.lt.s32.totalorder %s1626_s17, %s1622_s16 }
 0x11f   :  { %1380 = vmatprep.subr.bf16.mxu0 %v630_v56  ;;  %1542 = vmatprep.subr.bf16.mxu1 %v630_v56 }
 0x120   :  { %1381 = vmatpush3.bf16.msra.mxu0 %v2003_v61  ;;  %1550 = vmatpush3.bf16.msra.mxu1 %v2003_v61  ;;  %v1590_v61 = vld [vmem:[%s2251_s3 + $0x20] ss:$8 sps:$4 sm:$0xff]   ;;  %v2143_v32 = vpop.permute.xlu0 %686  ;;  %p1629_p3 = por %p1628_p2, %p1627_p1 }
 0x121   :  { %1382 = vmatprep.subr.bf16.mxu0 %v631_v54  ;;  %1543 = vmatprep.subr.bf16.mxu1 %v631_v54  ;;  %v2145_v62 = vpop.permute.xlu1 %691 }
 0x122   :  { %p1630_p4 = pnand %p1629_p3, %p1623_p0 }
 0x124   :  { %1383 = vmatpush3.bf16.msra.mxu0 %v2001_v41  ;;  %1551 = vmatpush3.bf16.msra.mxu1 %v2001_v41  ;;  %v1585_v41 = vld [vmem:[%s2251_s3 + $0x60] ss:$8 sps:$4 sm:$0xff]   ;;  %v2147_v36 = vpop.permute.xlu0 %776 }
 0x125   :  { %v2156_v38 = vpop.permute.xlu1 %781 }
 0x127   :  { %1017 = vmatmul.mubr.bf16.vlgmr.msra.gmra.mrb[32].mxu0 %v1574_v60  ;;  %1057 = vmatmul.mubr.bf16.vlgmr.msra.gmra.mrb[0].mxu1 %v1577_v23 }
 0x128   :  { %1024 = vmatprep.mubr.bf16.mxu0 %v1580_v33  ;;  %1064 = vmatprep.mubr.bf16.mxu1 %v1582_v46  ;;  %v2158_v43 = vpop.permute.xlu0 %696 }
 0x129   :  { %v2168_v14 = vpop.permute.xlu1 %701 }
 0x12c   :  { %v2170_v48 = vpop.permute.xlu0 %786 }
 0x12d   :  { %v2172_v51 = vpop.permute.xlu1 %791 }
 0x12f   :  { %1025 = vmatmul.mubr.bf16.gmra.mrb[36].mxu0 %v1584_v55  ;;  %1065 = vmatmul.mubr.bf16.gmra.mrb[4].mxu1 %v1585_v41 }
 0x130   :  { %1032 = vmatprep.mubr.bf16.mxu0 %v1586_v57  ;;  %1072 = vmatprep.mubr.bf16.mxu1 %v1588_v59  ;;  %v2174_v52 = vpop.permute.xlu0 %706 }
 0x131   :  { %v2176_v11 = vpop.permute.xlu1 %711 }
 0x134   :  { %v2178_v17 = vpop.permute.xlu0 %796 }
 0x135   :  { %v2180_v53 = vpop.permute.xlu1 %801 }
 0x137   :  { %1033 = vmatmul.mubr.bf16.gmra.mrb[40].mxu0 %v1590_v61  ;;  %1073 = vmatmul.mubr.bf16.gmra.mrb[8].mxu1 %v1591_v63 }
 0x138   :  { %1040 = vmatprep.mubr.bf16.mxu0 %v1592_v0  ;;  %1080 = vmatprep.mubr.bf16.mxu1 %v1594_v1  ;;  %v717_v54 = vpop.permute.xlu0 %716 }
 0x139   :  { %v722_v56 = vpop.permute.xlu1 %721 }
 0x13c   :  { %v2182_v60 = vpop.permute.xlu0 %806 }
 0x13d   :  { %v2184_v23 = vpop.permute.xlu1 %811 }
 0x13f   :  { %1041 = vmatmul.mubr.bf16.gmra.mrb[44].mxu0 %v1596_v2  ;;  %1081 = vmatmul.mubr.bf16.gmra.mrb[12].mxu1 %v1597_v3 }
 0x140   :  { %1048 = vmatprep.mubr.bf16.mxu0 %v1598_v4  ;;  %1088 = vmatprep.mubr.bf16.mxu1 %v1600_v5  ;;  %v727_v33 = vpop.permute.xlu0 %726 }
 0x147   :  { %1049 = vmatmul.mubr.bf16.gmra.mrb[48].mxu0 %v1602_v6  ;;  %1089 = vmatmul.mubr.bf16.gmra.mrb[16].mxu1 %v1603_v7 }
 0x148   :  { %1096 = vmatprep.mubr.bf16.mxu1 %v1604_v8  ;;  %1261 = vmatprep.mubr.bf16.mxu0 %v1226_v40 }
 0x14f   :  { %1097 = vmatmul.mubr.bf16.gmra.mrb[20].mxu1 %v1606_v9  ;;  %v732_v9 = vpop.permute.xlu1 %731 }
 0x150   :  { %1104 = vmatprep.mubr.bf16.mxu1 %v1607_v10  ;;  %v2186_v10 = vpop.permute.xlu0 %816 }
 0x157   :  { %1105 = vmatmul.mubr.bf16.gmra.mrb[24].mxu1 %v1609_v12 }
 0x158   :  { %1112 = vmatprep.mubr.bf16.mxu1 %v1610_v13 }
 0x15f   :  { %1113 = vmatmul.mubr.bf16.gmra.mrb[28].mxu1 %v1612_v15 }
 0x160   :  { %1120 = vmatprep.mubr.bf16.mxu1 %v1613_v16 }
 0x167   :  { %1121 = vmatmul.mubr.bf16.gmra.mrb[32].mxu1 %v1615_v26 }
 0x168   :  { %1128 = vmatprep.mubr.bf16.mxu1 %v1616_v18 }
 0x16f   :  { %1129 = vmatmul.mubr.bf16.gmra.mrb[36].mxu1 %v1618_v20 }
 0x170   :  { %1136 = vmatprep.mubr.bf16.mxu1 %v1619_v27 }
 0x177   :  { %1137 = vmatmul.mubr.bf16.gmra.mrb[40].mxu1 %v1621_v19 }
 0x1fa   :  { %v1384_v46 = vpop.f32.mrb[32].mxu0  ;;  %v1414_v55 = vpop.f32.mrb[0].mxu1 }
 0x1fb   :  { %v1385_v41 = vpop.f32.mrb[33].mxu0  ;;  %v1415_v57 = vpop.f32.mrb[1].mxu1 }
 0x1fc   :  { %v1386_v59 = vadd.f32 %v1385_v41, %v1384_v46  ;;  %v1416_v61 = vadd.f32 %v1415_v57, %v1414_v55  ;;  %v1387_v63 = vpop.f32.mrb[34].mxu0  ;;  %v1417_v0 = vpop.f32.mrb[2].mxu1 }
 0x1fd   :  { %v1388_v1 = vpop.f32.mrb[35].mxu0  ;;  %v1418_v2 = vpop.f32.mrb[3].mxu1 }
 0x1fe   :  { %v1019_v3 = vadd.f32 %v1386_v59, %v667_v34  ;;  %v1059_v4 = vadd.f32 %v1416_v61, %v717_v54  ;;  %v1389_v5 = vadd.f32 %v1388_v1, %v1387_v63  ;;  %v1419_v6 = vadd.f32 %v1418_v2, %v1417_v0  ;;  %v2194_v57 = vpop.permute.xlu1 %821  ;;  %v737_v59 = vpop.permute.xlu0 %736 }
 0x200   :  { %v1022_v7 = vadd.f32 %v1389_v5, %v672_v24  ;;  %v1062_v8 = vadd.f32 %v1419_v6, %v722_v56  ;;  %v1145_v12 = vmax.f32 %v1019_v3, 0.0  ;;  %v1155_v13 = vmax.f32 %v1059_v4, 0.0 }
 0x202   :  { %v1146_v15 = vmax.f32 %v1022_v7, 0.0  ;;  %v1156_v16 = vmax.f32 %v1062_v8, 0.0  ;;  %v1390_v26 = vpop.f32.mrb[36].mxu0  ;;  %v1420_v18 = vpop.f32.mrb[4].mxu1 }
 0x203   :  { %v1391_v20 = vpop.f32.mrb[37].mxu0  ;;  %v1421_v27 = vpop.f32.mrb[5].mxu1 }
 0x204   :  { %v2188_v19 = vpack.c.bf16 %v1146_v15, %v1145_v12  ;;  %v2190_v37 = vpack.c.bf16 %v1156_v16, %v1155_v13  ;;  %v1392_v34 = vadd.f32 %v1391_v20, %v1390_v26  ;;  %v1422_v45 = vadd.f32 %v1421_v27, %v1420_v18  ;;  %v1393_v58 = vpop.f32.mrb[38].mxu0  ;;  %v1423_v24 = vpop.f32.mrb[6].mxu1 }
 0x205   :  { %v1394_v44 = vpop.f32.mrb[39].mxu0  ;;  %v1424_v49 = vpop.f32.mrb[7].mxu1 }
 0x206   :  { %v1027_v40 = vadd.f32 %v1392_v34, %v2135_v35  ;;  %v1067_v54 = vadd.f32 %v1422_v45, %v727_v33  ;;  %v1395_v56 = vadd.f32 %v1394_v44, %v1393_v58  ;;  %v1425_v46 = vadd.f32 %v1424_v49, %v1423_v24  ;;  %v742_v18 = vpop.permute.xlu1 %741 }
 0x208   :  { %v1030_v55 = vadd.f32 %v1395_v56, %v2137_v28  ;;  %v1070_v41 = vadd.f32 %v1425_v46, %v732_v9  ;;  %v1147_v61 = vmax.f32 %v1027_v40, 0.0  ;;  %v1157_v63 = vmax.f32 %v1067_v54, 0.0 }
 0x20a   :  { %v1148_v0 = vmax.f32 %v1030_v55, 0.0  ;;  %v1158_v1 = vmax.f32 %v1070_v41, 0.0  ;;  %v1396_v2 = vpop.f32.mrb[40].mxu0  ;;  %v1426_v3 = vpop.f32.mrb[8].mxu1 }
 0x20b   :  { %v1397_v4 = vpop.f32.mrb[41].mxu0  ;;  %v1427_v5 = vpop.f32.mrb[9].mxu1 }
 0x20c   :  { %v2196_v6 = vpack.c.bf16 %v1148_v0, %v1147_v61  ;;  %v2198_v35 = vpack.c.bf16 %v1158_v1, %v1157_v63  ;;  %v1398_v33 = vadd.f32 %v1397_v4, %v1396_v2  ;;  %v1428_v7 = vadd.f32 %v1427_v5, %v1426_v3  ;;  %v1399_v8 = vpop.f32.mrb[42].mxu0  ;;  %v1429_v28 = vpop.f32.mrb[10].mxu1 }
 0x20d   :  { %v1400_v9 = vpop.f32.mrb[43].mxu0  ;;  %v1430_v12 = vpop.f32.mrb[11].mxu1 }
 0x20e   :  { %v1035_v13 = vadd.f32 %v1398_v33, %v2143_v32  ;;  %v1075_v15 = vadd.f32 %v1428_v7, %v737_v59  ;;  %v1401_v16 = vadd.f32 %v1400_v9, %v1399_v8  ;;  %v1431_v26 = vadd.f32 %v1430_v12, %v1429_v28 }
 0x210   :  { %v1038_v20 = vadd.f32 %v1401_v16, %v2145_v62  ;;  %v1078_v27 = vadd.f32 %v1431_v26, %v742_v18  ;;  %v1149_v34 = vmax.f32 %v1035_v13, 0.0  ;;  %v1159_v45 = vmax.f32 %v1075_v15, 0.0 }
 0x212   :  { %v1150_v58 = vmax.f32 %v1038_v20, 0.0  ;;  %v1160_v24 = vmax.f32 %v1078_v27, 0.0  ;;  %v1402_v44 = vpop.f32.mrb[44].mxu0  ;;  %v1432_v49 = vpop.f32.mrb[12].mxu1 }
 0x213   :  { %v1403_v40 = vpop.f32.mrb[45].mxu0  ;;  %v1433_v54 = vpop.f32.mrb[13].mxu1 }
 0x214   :  { %v2202_v56 = vpack.c.bf16 %v1150_v58, %v1149_v34  ;;  %v2204_v46 = vpack.c.bf16 %v1160_v24, %v1159_v45  ;;  %v1404_v32 = vadd.f32 %v1403_v40, %v1402_v44  ;;  %v1434_v55 = vadd.f32 %v1433_v54, %v1432_v49  ;;  %v1405_v41 = vpop.f32.mrb[46].mxu0  ;;  %v1435_v59 = vpop.f32.mrb[14].mxu1 }
 0x215   :  { %v1406_v61 = vpop.f32.mrb[47].mxu0  ;;  %v1436_v63 = vpop.f32.mrb[15].mxu1 }
 0x216   :  { %v1043_v62 = vadd.f32 %v1404_v32, %v2158_v43  ;;  %v1083_v0 = vadd.f32 %v1434_v55, %v2127_v22  ;;  %v1407_v1 = vadd.f32 %v1406_v61, %v1405_v41  ;;  %v1437_v2 = vadd.f32 %v1436_v63, %v1435_v59 }
 0x218   :  { %v1046_v3 = vadd.f32 %v1407_v1, %v2168_v14  ;;  %v1086_v4 = vadd.f32 %v1437_v2, %v2129_v21  ;;  %v1151_v5 = vmax.f32 %v1043_v62, 0.0  ;;  %v1161_v33 = vmax.f32 %v1083_v0, 0.0 }
 0x21a   :  { %v1152_v7 = vmax.f32 %v1046_v3, 0.0  ;;  %v1162_v8 = vmax.f32 %v1086_v4, 0.0  ;;  %v1408_v28 = vpop.f32.mrb[48].mxu0  ;;  %v1438_v9 = vpop.f32.mrb[16].mxu1 }
 0x21b   :  { %v1409_v12 = vpop.f32.mrb[49].mxu0  ;;  %v1439_v13 = vpop.f32.mrb[17].mxu1 }
 0x21c   :  { %v1181_v15 = vpack.c.bf16 %v1152_v7, %v1151_v5  ;;  %v1410_v16 = vadd.f32 %v1409_v12, %v1408_v28  ;;  %v1440_v26 = vadd.f32 %v1439_v13, %v1438_v9  ;;  %v1411_v43 = vpop.f32.mrb[50].mxu0  ;;  %v1441_v18 = vpop.f32.mrb[18].mxu1  ;;  %v1186_v22 = vpack.c.bf16 %v1162_v8, %v1161_v33 }
 0x21d   :  { %v1412_v20 = vpop.f32.mrb[51].mxu0  ;;  %v1442_v27 = vpop.f32.mrb[19].mxu1 }
 0x21e   :  { %v1051_v14 = vadd.f32 %v1410_v16, %v2174_v52  ;;  %v1091_v21 = vadd.f32 %v1440_v26, %v2131_v25  ;;  %v1413_v34 = vadd.f32 %v1412_v20, %v1411_v43  ;;  %v1443_v45 = vadd.f32 %v1442_v27, %v1441_v18  ;;  %1480 = vmatprep.subr.bf16.mxu0 %v1186_v22 }
 0x21f   :  { %1481 = vmatpush3.bf16.msra.mxu0 %v2188_v19 }
 0x220   :  { %v1054_v58 = vadd.f32 %v1413_v34, %v2176_v11  ;;  %v1094_v24 = vadd.f32 %v1443_v45, %v2133_v30  ;;  %v1153_v44 = vmax.f32 %v1051_v14, 0.0  ;;  %v1163_v49 = vmax.f32 %v1091_v21, 0.0 }
 0x222   :  { %v1154_v40 = vmax.f32 %v1054_v58, 0.0  ;;  %v1164_v54 = vmax.f32 %v1094_v24, 0.0  ;;  %v1444_v32 = vpop.f32.mrb[20].mxu1 }
 0x223   :  { %v1445_v55 = vpop.f32.mrb[21].mxu1 }
 0x224   :  { %v1182_v41 = vpack.c.bf16 %v1154_v40, %v1153_v44  ;;  %v1446_v59 = vadd.f32 %v1445_v55, %v1444_v32  ;;  %v1447_v52 = vpop.f32.mrb[22].mxu1  ;;  %v1187_v61 = vpack.c.bf16 %v1164_v54, %v1163_v49 }
 0x225   :  { %v1448_v25 = vpop.f32.mrb[23].mxu1 }
 0x226   :  { %v1099_v63 = vadd.f32 %v1446_v59, %v2139_v31  ;;  %v1449_v62 = vadd.f32 %v1448_v25, %v1447_v52  ;;  %1482 = vmatprep.subr.bf16.mxu0 %v1187_v61 }
 0x227   :  { %1483 = vmatpush3.bf16.msra.mxu0 %v2196_v6 }
 0x228   :  { %v1102_v11 = vadd.f32 %v1449_v62, %v2141_v29  ;;  %v1165_v30 = vmax.f32 %v1099_v63, 0.0 }
 0x22a   :  { %v1166_v19 = vmax.f32 %v1102_v11, 0.0  ;;  %v1450_v0 = vpop.f32.mrb[24].mxu1 }
 0x22b   :  { %v1451_v1 = vpop.f32.mrb[25].mxu1 }
 0x22c   :  { %v1452_v2 = vadd.f32 %v1451_v1, %v1450_v0  ;;  %v1453_v3 = vpop.f32.mrb[26].mxu1  ;;  %v1188_v4 = vpack.c.bf16 %v1166_v19, %v1165_v30  ;;  %v1198_v1 = vpop.permute.xlu0 %1197 }
 0x22d   :  { %v1454_v5 = vpop.f32.mrb[27].mxu1 }
 0x22e   :  { %v1107_v33 = vadd.f32 %v1452_v2, %v2147_v36  ;;  %v1455_v7 = vadd.f32 %v1454_v5, %v1453_v3  ;;  %1484 = vmatprep.subr.bf16.mxu0 %v1188_v4 }
 0x22f   :  { %1485 = vmatpush3.bf16.msra.mxu0 %v2202_v56 }
 0x230   :  { %v1110_v31 = vadd.f32 %v1455_v7, %v2156_v38  ;;  %v1167_v8 = vmax.f32 %v1107_v33, 0.0 }
 0x232   :  { %v1168_v6 = vmax.f32 %v1110_v31, 0.0  ;;  %v1456_v28 = vpop.f32.mrb[28].mxu1 }
 0x233   :  { %v1457_v29 = vpop.f32.mrb[29].mxu1 }
 0x234   :  { %v1458_v9 = vadd.f32 %v1457_v29, %v1456_v28  ;;  %v1459_v12 = vpop.f32.mrb[30].mxu1  ;;  %v1189_v13 = vpack.c.bf16 %v1168_v6, %v1167_v8 }
 0x235   :  { %v1460_v16 = vpop.f32.mrb[31].mxu1 }
 0x236   :  { %v1115_v26 = vadd.f32 %v1458_v9, %v2170_v48  ;;  %v1461_v43 = vadd.f32 %v1460_v16, %v1459_v12  ;;  %1486 = vmatprep.subr.bf16.mxu0 %v1189_v13 }
 0x237   :  { %1487 = vmatpush3.bf16.msra.mxu0 %v1181_v15 }
 0x238   :  { %v1118_v36 = vadd.f32 %v1461_v43, %v2172_v51  ;;  %v1169_v18 = vmax.f32 %v1115_v26, 0.0 }
 0x23a   :  { %v1170_v22 = vmax.f32 %v1118_v36, 0.0  ;;  %v1462_v56 = vpop.f32.mrb[32].mxu1 }
 0x23b   :  { %v1463_v20 = vpop.f32.mrb[33].mxu1 }
 0x23c   :  { %v1464_v38 = vadd.f32 %v1463_v20, %v1462_v56  ;;  %v1465_v27 = vpop.f32.mrb[34].mxu1  ;;  %v1190_v14 = vpack.c.bf16 %v1170_v22, %v1169_v18 }
 0x23d   :  { %v1466_v21 = vpop.f32.mrb[35].mxu1 }
 0x23e   :  { %v1123_v34 = vadd.f32 %v1464_v38, %v2178_v17  ;;  %v1467_v45 = vadd.f32 %v1466_v21, %v1465_v27  ;;  %1488 = vmatprep.subr.bf16.mxu0 %v1190_v14 }
 0x23f   :  { %1489 = vmatpush3.bf16.msra.mxu0 %v1182_v41 }
 0x240   :  { %v1126_v48 = vadd.f32 %v1467_v45, %v2180_v53  ;;  %v1171_v58 = vmax.f32 %v1123_v34, 0.0 }
 0x242   :  { %v1172_v24 = vmax.f32 %v1126_v48, 0.0  ;;  %v1468_v15 = vpop.f32.mrb[36].mxu1 }
 0x243   :  { %v1469_v44 = vpop.f32.mrb[37].mxu1 }
 0x244   :  { %v1470_v51 = vadd.f32 %v1469_v44, %v1468_v15  ;;  %v1471_v49 = vpop.f32.mrb[38].mxu1  ;;  %v1191_v40 = vpack.c.bf16 %v1172_v24, %v1171_v58 }
 0x245   :  { %v1472_v54 = vpop.f32.mrb[39].mxu1 }
 0x246   :  { %v1131_v32 = vadd.f32 %v1470_v51, %v2182_v60  ;;  %v1473_v55 = vadd.f32 %v1472_v54, %v1471_v49  ;;  %1490 = vmatprep.subr.bf16.mxu0 %v1191_v40 }
 0x247   :  { %1491 = vmatpush3.bf16.msra.mxu0 %v2190_v37 }
 0x248   :  { %v1134_v17 = vadd.f32 %v1473_v55, %v2184_v23  ;;  %v1173_v59 = vmax.f32 %v1131_v32, 0.0  ;;  %v1202_v23 = vsub.s32 0, %v2149_v42 }
 0x24a   :  { %v1174_v41 = vmax.f32 %v1134_v17, 0.0  ;;  %v1474_v52 = vpop.f32.mrb[40].mxu1 }
 0x24b   :  { %v1475_v53 = vpop.f32.mrb[41].mxu1 }
 0x24c   :  { %v1476_v61 = vadd.f32 %v1475_v53, %v1474_v52  ;;  %v1477_v25 = vpop.f32.mrb[42].mxu1  ;;  %v1192_v63 = vpack.c.bf16 %v1174_v41, %v1173_v59 }
 0x24d   :  { %v1478_v62 = vpop.f32.mrb[43].mxu1 }
 0x24e   :  { %v1139_v11 = vadd.f32 %v1476_v61, %v2186_v10  ;;  %v1479_v30 = vadd.f32 %v1478_v62, %v1477_v25  ;;  %1492 = vmatprep.subr.bf16.mxu0 %v1192_v63 }
 0x24f   :  { %1493 = vmatpush3.bf16.msra.mxu0 %v2198_v35  ;;  %v1203_v35 = vrot.slane %v1198_v1, %v1202_v23 }
 0x250   :  { %v1142_v60 = vadd.f32 %v1479_v30, %v2194_v57  ;;  %v1175_v19 = vmax.f32 %v1139_v11, 0.0 }
 0x252   :  { %v1176_v37 = vmax.f32 %v1142_v60, 0.0 }
 0x254   :  { %v1193_v0 = vpack.c.bf16 %v1176_v37, %v1175_v19 }
 0x256   :  { %1494 = vmatprep.subr.bf16.mxu0 %v1193_v0 }
 0x257   :  { %1495 = vmatpush3.bf16.msra.mxu0 %v2204_v46 }
 0x25a   :  { %1262 = vmatmul.mubr.bf16.vlgmr.msra.gmra.mrb[52].mxu0 %v1219_v50 }
 0x32d   :  { %v1496_v10 = vpop.f32.mrb[52].mxu0 }
 0x32e   :  { %v1497_v2 = vpop.f32.mrb[53].mxu0 }
 0x32f   :  { %v1498_v3 = vadd.f32 %v1497_v2, %v1496_v10  ;;  %v1499_v57 = vpop.f32.mrb[54].mxu0 }
 0x330   :  { %v1500_v4 = vpop.f32.mrb[55].mxu0 }
 0x331   :  { %v1264_v5 = vadd.f32 %v1498_v3, %v1203_v35 }
 0x333   :  { %1270 = vst.msk [vmem:[#allocation3] sm:$0x1] %vm1269_vm1, %v1264_v5 }
 0x334   :  { %1633 = shalt.err (!%p1630_p4)
}
 0x335   :  { %s1634_s20 = scalar_lea.hbm %s2255_s7, 16 }
 0x336   :  { %p1635_p5 = scmp.ne.s32.totalorder %s2255_s7, %s1634_s20  ;;  %p1638_p6 = scmp.lt.u32.totalorder %s1634_s20, %s2255_s7 }
 0x338   :  { %p1640_p7 = pnand %p1638_p6, %p1635_p5 }
 0x33a   :  { %1643 = shalt.err (!%p1640_p7)
}
 0x33b   :  { %1280 = dma.vmem_to_hbm [thread:$0]  %s1278_s0, 16, %s2255_s7, [#allocation4]  }
 0x33c   :  { %1644 = dma.done.wait [#allocation4], 16  }
 0x33d   :  { %1645 = vsyncadd [#allocation4], 4294967280 }
 0x33e   :  { %1284 = vsyncpa [#allocation4], 1 }

</bundles_post_ra>
